<compile_context>
chip_gen: v7x
topology: tpu7x:2x2x1
jax: 0.10.0
libtpu: 0.0.40
codegen_flags: <defaults>
</compile_context>

<pallas_src>
import functools

import jax
import jax.numpy as jnp
from jax.experimental import pallas as pl
from jax.experimental.pallas import tpu as pltpu

SUBLANE = 8


def _round_up(x, m):
    return (x + m - 1) // m * m


def qnet_kernel(x_ref, w1_ref, b1_ref, w2_ref, b2_ref, w3_ref, b3_ref, o_ref):
    # One batch tile per grid step; whole MLP fused, all weights resident in VMEM.
    # Matmuls run in the weights' dtype (bf16 by default) with f32 accumulation;
    # bias add / ReLU stay f32.
    x = x_ref[...]
    h = jnp.dot(x, w1_ref[...], preferred_element_type=jnp.float32) + b1_ref[...]
    h = jnp.maximum(h, 0.0)                                        # relu(fc1), f32
    h = h.astype(w2_ref.dtype)
    h = jnp.dot(h, w2_ref[...], preferred_element_type=jnp.float32) + b2_ref[...]
    h = jnp.maximum(h, 0.0)                                        # relu(fc2), f32
    h = h.astype(w3_ref.dtype)
    out = jnp.dot(h, w3_ref[...], preferred_element_type=jnp.float32) + b3_ref[...]
    o_ref[...] = out.astype(o_ref.dtype)                           # fc3, [TB, action_size]


def prepare_params(params, compute_dtype=jnp.bfloat16):
    """One-time parameter prep (hoisted out of the per-call wrapper).

    Casts matmul weights to `compute_dtype`; biases stay f32 (added to the f32
    accumulator inside the kernel).  W is [in, out], b is [1, out].
    """
    return {
        name: (w.astype(compute_dtype), b.astype(jnp.float32))
        for name, (w, b) in params.items()
    }


@functools.partial(jax.jit, static_argnames=("block_batch", "min_pallas_batch"))
def qnetwork_forward(state, params, *, block_batch=2048, min_pallas_batch=0):
    """state: [B, state_size] f32.  params: output of prepare_params()."""
    w1, b1 = params["fc1"]
    w2, b2 = params["fc2"]
    w3, b3 = params["fc3"]
    B, S = state.shape
    A = w3.shape[1]
    compute_dtype = w1.dtype

    if B <= min_pallas_batch:
        # Tiny online action-selection batches: plain XLA matmuls — pallas_call
        # launch + 7 input DMAs would dwarf the ~100k-FLOP compute.
        h = jnp.maximum(
            jnp.dot(state.astype(compute_dtype), w1, preferred_element_type=jnp.float32) + b1, 0.0)
        h = jnp.maximum(
            jnp.dot(h.astype(compute_dtype), w2, preferred_element_type=jnp.float32) + b2, 0.0)
        return jnp.dot(h.astype(compute_dtype), w3, preferred_element_type=jnp.float32) + b3

    # Tile choice: fewest full tiles respecting block_batch, but >= 2 grid steps
    # whenever the batch allows it (so "parallel" can shard across v7x's two
    # TensorCores; no-op on single-TC v5e/v6e).  TB is always a multiple of 8
    # and B_pad hugs B (minimal padded rows -> minimal extra DMA/writeback).
    want_tiles = max(pl.cdiv(B, block_batch), 2 if B > SUBLANE else 1)
    TB = _round_up(pl.cdiv(B, want_tiles), SUBLANE)
    B_pad = _round_up(B, TB)

    x = state.astype(compute_dtype)
    if B_pad != B:
        x = jnp.pad(x, ((0, B_pad - B), (0, 0)))

    grid = (B_pad // TB,)
    resident = lambda i: (0, 0)  # weights/biases: same block every step -> fetched once, stay in VMEM

    out = pl.pallas_call(
        qnet_kernel,
        out_shape=jax.ShapeDtypeStruct((B_pad, A), jnp.float32),
        grid=grid,
        in_specs=[
            pl.BlockSpec((TB, S), lambda i: (i, 0)),     # x: blocked along batch
            pl.BlockSpec(w1.shape, resident),
            pl.BlockSpec(b1.shape, resident),
            pl.BlockSpec(w2.shape, resident),
            pl.BlockSpec(b2.shape, resident),
            pl.BlockSpec(w3.shape, resident),
            pl.BlockSpec(b3.shape, resident),
        ],
        # Output block's last dim == full array dim (action_size), so no (8,128)
        # violation; masked store is fine — the vst slot has huge slack here.
        out_specs=pl.BlockSpec((TB, A), lambda i: (i, 0)),
        compiler_params=pltpu.CompilerParams(
            dimension_semantics=("parallel",),            # shard batch grid across TCs (v7x)
            vmem_limit_bytes=32 * 1024 * 1024,            # safe on v5e's smaller scoped default
        ),
    )(x, w1, b1, w2, b2, w3, b3)
    return out[:B] if B_pad != B else out


def init_linear(key, fan_in, fan_out):
    """Mimics torch.nn.Linear default init (U[-1/sqrt(fan_in), 1/sqrt(fan_in)]).
    Returns W as [in, out] and b as [1, out]."""
    kw, kb = jax.random.split(key)
    bound = 1.0 / jnp.sqrt(jnp.float32(fan_in))
    w = jax.random.uniform(kw, (fan_in, fan_out), jnp.float32, -bound, bound)
    b = jax.random.uniform(kb, (1, fan_out), jnp.float32, -bound, bound)
    return w, b


if __name__ == "__main__":
    state_size = 16
    action_size = 4

    key = jax.random.PRNGKey(0)
    k_in, k1, k2, k3, k_big = jax.random.split(key, 5)

    raw_params = {
        "fc1": init_linear(k1, state_size, 64),
        "fc2": init_linear(k2, 64, 64),
        "fc3": init_linear(k3, 64, action_size),
    }

    # Pure-JAX references.
    def ref_f32(x, p):
        h = jnp.maximum(x @ p["fc1"][0] + p["fc1"][1], 0.0)
        h = jnp.maximum(h @ p["fc2"][0] + p["fc2"][1], 0.0)
        return h @ p["fc3"][0] + p["fc3"][1]

    def ref_cast(x, p):
        # Same bf16-in / f32-accumulate recipe as the kernel's default path.
        (w1, b1), (w2, b2), (w3, b3) = p["fc1"], p["fc2"], p["fc3"]
        h = jnp.maximum(jnp.dot(x.astype(w1.dtype), w1, preferred_element_type=jnp.float32) + b1, 0.0)
        h = jnp.maximum(jnp.dot(h.astype(w2.dtype), w2, preferred_element_type=jnp.float32) + b2, 0.0)
        return jnp.dot(h.astype(w3.dtype), w3, preferred_element_type=jnp.float32) + b3

    # 1) f32 compute path, small batch (grid = 1): exact check vs f32 reference.
    params_f32 = prepare_params(raw_params, compute_dtype=jnp.float32)
    state = jax.random.normal(k_in, (8, state_size), jnp.float32)
    out = jax.block_until_ready(qnetwork_forward(state, params_f32))
    assert out.shape == (8, action_size)
    assert jnp.allclose(out, ref_f32(state, raw_params), atol=1e-5, rtol=1e-5)

    # 2) Default bf16 compute path, non-aligned batch exercising the batch grid
    #    (grid = 3) and the padding/slice path.
    params_bf16 = prepare_params(raw_params)              # hoisted one-time prep
    big_batch = 130
    state_big = jax.random.normal(k_big, (big_batch, state_size), jnp.float32)
    out_big = jax.block_until_ready(
        qnetwork_forward(state_big, params_bf16, block_batch=64))
    assert out_big.shape == (big_batch, action_size)
    # Tight check vs a reference using the same bf16 matmul recipe...
    assert jnp.allclose(out_big, ref_cast(state_big, params_bf16), atol=2e-3, rtol=2e-3)
    # ...and a loose sanity check vs the full-f32 reference.
    assert jnp.allclose(out_big, ref_f32(state_big, raw_params), atol=1e-1, rtol=1e-1)

    print("KERNEL_OK")
</pallas_src>

<mosaic_0001>
module attributes {stable_mosaic.version = 11 : i64} {
  func.func @qnet_kernel(%arg0: i32, %arg1: memref<8x16xf32, #tpu.memory_space<vmem>>, %arg2: memref<16x64xf32, #tpu.memory_space<vmem>>, %arg3: memref<1x64xf32, #tpu.memory_space<vmem>>, %arg4: memref<64x64xf32, #tpu.memory_space<vmem>>, %arg5: memref<1x64xf32, #tpu.memory_space<vmem>>, %arg6: memref<64x4xf32, #tpu.memory_space<vmem>>, %arg7: memref<1x4xf32, #tpu.memory_space<vmem>>, %arg8: memref<8x4xf32, #tpu.memory_space<vmem>>) attributes {dimension_semantics = [#tpu.dimension_semantics<parallel>], iteration_bounds = array<i64: 1>, scalar_prefetch = 0 : i64, scratch_operands = 0 : i64, tpu.core_type = #tpu.core_type<tc>, window_params = [{transform_indices = @transform_0, window_bounds = array<i64: 8, 16>}, {pipeline_mode = #tpu.pipeline_mode<synchronous>, transform_indices = @transform_1, window_bounds = array<i64: 16, 64>}, {pipeline_mode = #tpu.pipeline_mode<synchronous>, transform_indices = @transform_2, window_bounds = array<i64: 1, 64>}, {pipeline_mode = #tpu.pipeline_mode<synchronous>, transform_indices = @transform_3, window_bounds = array<i64: 64, 64>}, {pipeline_mode = #tpu.pipeline_mode<synchronous>, transform_indices = @transform_4, window_bounds = array<i64: 1, 64>}, {pipeline_mode = #tpu.pipeline_mode<synchronous>, transform_indices = @transform_5, window_bounds = array<i64: 64, 4>}, {pipeline_mode = #tpu.pipeline_mode<synchronous>, transform_indices = @transform_6, window_bounds = array<i64: 1, 4>}, {transform_indices = @transform_7, window_bounds = array<i64: 8, 4>}]} {
    %c0 = arith.constant 0 : index
    %c0_0 = arith.constant 0 : index
    %0 = vector.load %arg1[%c0, %c0_0] : memref<8x16xf32, #tpu.memory_space<vmem>>, vector<8x16xf32>
    %c0_1 = arith.constant 0 : index
    %c0_2 = arith.constant 0 : index
    %1 = vector.load %arg2[%c0_1, %c0_2] : memref<16x64xf32, #tpu.memory_space<vmem>>, vector<16x64xf32>
    %cst = arith.constant dense<0.000000e+00> : vector<8x64xf32>
    %2 = tpu.matmul %0, %1, %cst {dimension_numbers = #tpu.dot_dimension_numbers<[1], [0], [0], [1], [0, 0, 1, 1], [], []>} : vector<8x16xf32>, vector<16x64xf32>, vector<8x64xf32> -> vector<8x64xf32>
    %c0_3 = arith.constant 0 : index
    %c0_4 = arith.constant 0 : index
    %3 = vector.load %arg3[%c0_3, %c0_4] : memref<1x64xf32, #tpu.memory_space<vmem>>, vector<1x64xf32>
    %4 = vector.broadcast %3 : vector<1x64xf32> to vector<8x64xf32>
    %5 = arith.addf %2, %4 : vector<8x64xf32>
    %cst_5 = arith.constant 0.000000e+00 : f32
    %6 = vector.broadcast %cst_5 : f32 to vector<8x64xf32>
    %7 = arith.maximumf %5, %6 : vector<8x64xf32>
    %c0_6 = arith.constant 0 : index
    %c0_7 = arith.constant 0 : index
    %8 = vector.load %arg4[%c0_6, %c0_7] : memref<64x64xf32, #tpu.memory_space<vmem>>, vector<64x64xf32>
    %cst_8 = arith.constant dense<0.000000e+00> : vector<8x64xf32>
    %9 = tpu.matmul %7, %8, %cst_8 {dimension_numbers = #tpu.dot_dimension_numbers<[1], [0], [0], [1], [0, 0, 1, 1], [], []>} : vector<8x64xf32>, vector<64x64xf32>, vector<8x64xf32> -> vector<8x64xf32>
    %c0_9 = arith.constant 0 : index
    %c0_10 = arith.constant 0 : index
    %10 = vector.load %arg5[%c0_9, %c0_10] : memref<1x64xf32, #tpu.memory_space<vmem>>, vector<1x64xf32>
    %11 = vector.broadcast %10 : vector<1x64xf32> to vector<8x64xf32>
    %12 = arith.addf %9, %11 : vector<8x64xf32>
    %cst_11 = arith.constant 0.000000e+00 : f32
    %13 = vector.broadcast %cst_11 : f32 to vector<8x64xf32>
    %14 = arith.maximumf %12, %13 : vector<8x64xf32>
    %c0_12 = arith.constant 0 : index
    %c0_13 = arith.constant 0 : index
    %15 = vector.load %arg6[%c0_12, %c0_13] : memref<64x4xf32, #tpu.memory_space<vmem>>, vector<64x4xf32>
    %cst_14 = arith.constant dense<0.000000e+00> : vector<8x4xf32>
    %16 = tpu.matmul %14, %15, %cst_14 {dimension_numbers = #tpu.dot_dimension_numbers<[1], [0], [0], [1], [0, 0, 1, 1], [], []>} : vector<8x64xf32>, vector<64x4xf32>, vector<8x4xf32> -> vector<8x4xf32>
    %c0_15 = arith.constant 0 : index
    %c0_16 = arith.constant 0 : index
    %17 = vector.load %arg7[%c0_15, %c0_16] : memref<1x4xf32, #tpu.memory_space<vmem>>, vector<1x4xf32>
    %18 = vector.broadcast %17 : vector<1x4xf32> to vector<8x4xf32>
    %19 = arith.addf %16, %18 : vector<8x4xf32>
    %c0_17 = arith.constant 0 : index
    %c0_18 = arith.constant 0 : index
    %20 = vector.load %arg8[%c0_17, %c0_18] : memref<8x4xf32, #tpu.memory_space<vmem>>, vector<8x4xf32>
    tpu.vector_store %arg8[%c0_17, %c0_18], %19 {strides = array<i32>} : memref<8x4xf32, #tpu.memory_space<vmem>>, vector<8x4xf32>,
    return
  }
  func.func @transform_0(%arg0: i32) -> (i32, i32) {
    %c0_i32 = arith.constant 0 : i32
    %c0_i32_0 = arith.constant 0 : i32
    return %arg0, %c0_i32 : i32, i32
  }
  func.func @transform_1(%arg0: i32) -> (i32, i32) {
    %c0_i32 = arith.constant 0 : i32
    %c0_i32_0 = arith.constant 0 : i32
    %c0_i32_1 = arith.constant 0 : i32
    return %c0_i32, %c0_i32_0 : i32, i32
  }
  func.func @transform_2(%arg0: i32) -> (i32, i32) {
    %c0_i32 = arith.constant 0 : i32
    %c0_i32_0 = arith.constant 0 : i32
    %c0_i32_1 = arith.constant 0 : i32
    return %c0_i32, %c0_i32_0 : i32, i32
  }
  func.func @transform_3(%arg0: i32) -> (i32, i32) {
    %c0_i32 = arith.constant 0 : i32
    %c0_i32_0 = arith.constant 0 : i32
    %c0_i32_1 = arith.constant 0 : i32
    return %c0_i32, %c0_i32_0 : i32, i32
  }
  func.func @transform_4(%arg0: i32) -> (i32, i32) {
    %c0_i32 = arith.constant 0 : i32
    %c0_i32_0 = arith.constant 0 : i32
    %c0_i32_1 = arith.constant 0 : i32
    return %c0_i32, %c0_i32_0 : i32, i32
  }
  func.func @transform_5(%arg0: i32) -> (i32, i32) {
    %c0_i32 = arith.constant 0 : i32
    %c0_i32_0 = arith.constant 0 : i32
    %c0_i32_1 = arith.constant 0 : i32
    return %c0_i32, %c0_i32_0 : i32, i32
  }
  func.func @transform_6(%arg0: i32) -> (i32, i32) {
    %c0_i32 = arith.constant 0 : i32
    %c0_i32_0 = arith.constant 0 : i32
    %c0_i32_1 = arith.constant 0 : i32
    return %c0_i32, %c0_i32_0 : i32, i32
  }
  func.func @transform_7(%arg0: i32) -> (i32, i32) {
    %c0_i32 = arith.constant 0 : i32
    %c0_i32_0 = arith.constant 0 : i32
    return %arg0, %c0_i32 : i32, i32
  }
}

</mosaic_0001>

<bundles_post_ra>
// kernel: qnetwork_forward.1
= control target key start
LH: loop header
LB: loop body
LE: loop exit
PB: predicated region body
PF: predicated region fallthrough
CT: control target
= control target key end

     0   :  { %12 = vsyncpa [#allocation3], 0  ;;  %s439_s24 = smov [#allocation2]   ;;  %s563_s0 = inlined_call_operand.vmem [shape: f32[8,16], index: 0, kind: input, shape index: {}]   ;;  %s564_s1 = inlined_call_operand.hbm [shape: f32[16,64], index: 1, kind: input, shape index: {}]   ;;  %s565_s2 = inlined_call_operand.vmem [shape: f32[1,64], index: 2, kind: input, shape index: {}]   ;;  %s566_s3 = inlined_call_operand.vmem [shape: f32[64,64], index: 3, kind: input, shape index: {}]   ;;  %s567_s4 = inlined_call_operand.vmem [shape: f32[1,64], index: 4, kind: input, shape index: {}]   ;;  %s568_s5 = inlined_call_operand.vmem [shape: f32[64,4], index: 5, kind: input, shape index: {}]   ;;  %s569_s6 = inlined_call_operand.vmem [shape: f32[1,4], index: 6, kind: input, shape index: {}]   ;;  %s570_s7 = inlined_call_operand.vmem [shape: f32[8,4], index: 7, kind: output, shape index: {}]  }
   0x1   :  { %s20_s25 = sshll.u32 %s439_s24, 4  ;;  %s415_s28 = scalar_lea.hbm %s564_s1, 256  ;;  %s21_s25 = int_to_ptr.vmem [resolvable:$true] %s20_s25 }
   0x2   :  { %p416_p0 = scmp.ne.s32.totalorder %s564_s1, %s415_s28  ;;  %p419_p1 = scmp.lt.u32.totalorder %s415_s28, %s564_s1 }
   0x4   :  { %p421_p2 = pnand %p419_p1, %p416_p0 }
   0x6   :  { %424 = shalt.err (!%p421_p2)
}
   0x7   :  { %s425_s10 = scalar_lea.vmem %s21_s25, 256  ;;  %p430_p4 = scmp.lt.s32.totalorder %s21_s25, %s21_s25 }
   0x8   :  { %p426_p3 = scmp.ne.s32.totalorder %s21_s25, %s425_s10  ;;  %p431_p5 = scmp.lt.s32.totalorder %s425_s10, %s425_s10 }
   0xa   :  { %p432_p6 = por %p431_p5, %p430_p4 }
   0xc   :  { %p433_p7 = pnand %p432_p6, %p426_p3 }
   0xe   :  { %436 = shalt.err (!%p433_p7)
}
   0xf   :  { %s440_s11 = smov 128   ;;  %s441_s12 = smov 8  }
  0x10   :  { %26 = dma.hbm_to_vmem [thread:$0]  %s564_s1, 256, %s21_s25, [#allocation3], %s440_s11, %s440_s11, %s441_s12  }
  0x11   :  { %437 = dma.done.wait [#allocation3], 256  }
  0x12   :  { %438 = vsyncadd [#allocation3], 4294967040  ;;  %v442_v0 = vmov 0.0|0.0   ;;  %vm443_vm0 = vmmov 0   ;;  %v444_v1 = vmov 0.0   ;;  %v41_v2 = vld [vmem:[#allocation2] sm:$0xff] }
  0x13   :  { %382 = vmatprep.subr.bf16.mxu0 %v442_v0  ;;  %341 = vmatprep.mubr.msk.f32.mxu0 %vm443_vm0, %v444_v1  ;;  %v42_v3 = vld [vmem:[#allocation2 + $0x8] sm:$0xff]  ;;  %v125_v5 = vld [vmem:[%s566_s3] sm:$0xff]  ;;  %v127_v7 = vld [vmem:[%s566_s3 + $0x10] sm:$0xff]  ;;  %vm50_vm1 = vcmask 130048   ;;  %vm140_vm2 = vcmask 523264   ;;  %vm303_vm3 = vcmask 31744  }
  0x14   :  { %385 = vmatprep.subr.bf16.mxu1 %v442_v0  ;;  %360 = vmatprep.mubr.msk.f32.mxu1 %vm443_vm0, %v444_v1  ;;  %v383_v4 = vpack.c.bf16 %v42_v3, %v41_v2  ;;  %v126_v6 = vld [vmem:[%s566_s3 + $0x8] sm:$0xff]  ;;  %v128_v9 = vld [vmem:[%s566_s3 + $0x18] sm:$0xff]  ;;  %v40_v10 = vld [vmem:[%s563_s0] sm:$0xff] }
  0x15   :  { %v386_v8 = vpack.c.bf16 %v126_v6, %v125_v5  ;;  %v389_v11 = vpack.c.bf16 %v128_v9, %v127_v7  ;;  %v129_v12 = vld [vmem:[%s566_s3 + $0x20] sm:$0xff]  ;;  %v130_v13 = vld [vmem:[%s566_s3 + $0x28] sm:$0xff]  ;;  %v131_v15 = vld [vmem:[%s566_s3 + $0x30] sm:$0xff] }
  0x16   :  { %384 = vmatpush3.bf16.msra.mxu0 %v383_v4  ;;  %v392_v14 = vpack.c.bf16 %v130_v13, %v129_v12  ;;  %v132_v16 = vld [vmem:[%s566_s3 + $0x38] sm:$0xff]  ;;  %v215_v18 = vld [vmem:[%s568_s5] sm:$0xff]  ;;  %v216_v19 = vld [vmem:[%s568_s5 + $0x8] sm:$0xff] }
  0x17   :  { %387 = vmatpush3.bf16.msra.mxu1 %v386_v8  ;;  %397 = vmatprep.subr.bf16.mxu0 %v442_v0  ;;  %v395_v17 = vpack.c.bf16 %v132_v16, %v131_v15  ;;  %v217_v20 = vld [vmem:[%s568_s5 + $0x10] sm:$0xff]  ;;  %v398_v21 = vpack.c.bf16 %v216_v19, %v215_v18  ;;  %v218_v22 = vld [vmem:[%s568_s5 + $0x18] sm:$0xff]  ;;  %v219_v24 = vld [vmem:[%s568_s5 + $0x20] sm:$0xff] }
  0x18   :  { %388 = vmatprep.subr.bf16.mxu1 %v442_v0  ;;  %v401_v23 = vpack.c.bf16 %v218_v22, %v217_v20  ;;  %v220_v25 = vld [vmem:[%s568_s5 + $0x28] sm:$0xff]  ;;  %v310_v27 = vld [vmem:[%s565_s2] ss:$0 sm:$0xff]  ;;  %v221_v32 = vld [vmem:[%s568_s5 + $0x30] sm:$0xff] }
  0x19   :  { %342 = vmatmul.mubr.msk.f32.vlgmr.msra.gmra.mrb[0].mxu0 %vm50_vm1, %v40_v10  ;;  %v404_v26 = vpack.c.bf16 %v220_v25, %v219_v24  ;;  %v222_v33 = vld [vmem:[%s568_s5 + $0x38] sm:$0xff]  ;;  %v312_v35 = vld [vmem:[%s567_s4] ss:$0 sm:$0xff] }
  0x1a   :  { %379 = vmatprep.mubr.msk.f32.mxu0 %vm443_vm0, %v444_v1  ;;  %399 = vmatpush3.bf16.msra.mxu0 %v398_v21  ;;  %v407_v34 = vpack.c.bf16 %v222_v33, %v221_v32  ;;  %v314_v40 = vld [vmem:[%s569_s6] ss:$0 sm:$0xff] }
  0x1b   :  { %390 = vmatpush3.bf16.msra.mxu1 %v389_v11  ;;  %400 = vmatprep.subr.bf16.mxu0 %v442_v0 }
  0x1c   :  { %391 = vmatprep.subr.bf16.mxu1 %v442_v0 }
  0x1e   :  { %402 = vmatpush3.bf16.msra.mxu0 %v401_v23 }
  0x1f   :  { %393 = vmatpush3.bf16.msra.mxu1 %v392_v14  ;;  %403 = vmatprep.subr.bf16.mxu0 %v442_v0 }
  0x20   :  { %394 = vmatprep.subr.bf16.mxu1 %v442_v0 }
  0x22   :  { %405 = vmatpush3.bf16.msra.mxu0 %v404_v26 }
  0x23   :  { %396 = vmatpush3.bf16.msra.mxu1 %v395_v17  ;;  %406 = vmatprep.subr.bf16.mxu0 %v442_v0 }
  0x26   :  { %408 = vmatpush3.bf16.msra.mxu0 %v407_v34 }
  0xec   :  { %v120_v28 = vpop.f32.mrb[0].mxu0 }
  0xed   :  { %v121_v29 = vadd.f32 %v310_v27, %v120_v28  ;;  %v343_v30 = vpop.f32.mrb[1].mxu0 }
  0xef   :  { %v124_v31 = vmax.f32 %v121_v29, 0.0 }
  0xf1   :  { %361 = vmatmul.mubr.msk.f32.vlgmr.msra.gmra.mrb[0].mxu1 %vm140_vm2, %v124_v31 }
 0x1c4   :  { %v210_v36 = vpop.f32.mrb[0].mxu1 }
 0x1c5   :  { %v211_v37 = vadd.f32 %v312_v35, %v210_v36  ;;  %v362_v38 = vpop.f32.mrb[1].mxu1 }
 0x1c7   :  { %v214_v39 = vmax.f32 %v211_v37, 0.0 }
 0x1c9   :  { %380 = vmatmul.mubr.msk.f32.vlgmr.msra.gmra.mrb[2].mxu0 %vm140_vm2, %v214_v39 }
 0x29c   :  { %v299_v41 = vpop.f32.mrb[2].mxu0 }
 0x29d   :  { %v300_v42 = vadd.f32 %v314_v40, %v299_v41  ;;  %v381_v43 = vpop.f32.mrb[3].mxu0 }
 0x29f   :  { %304 = vst.msk [vmem:[%s570_s7] sm:$0xff] %vm303_vm3, %v300_v42 }
 0x2a0   :  { %309 = vsyncpa [#allocation3], 1 }

</bundles_post_ra>
